<compile_context>
chip_gen: v7x
topology: tpu7x:2x2x1
jax: 0.10.0
libtpu: 0.0.40
codegen_flags: <defaults>
</compile_context>

<pallas_src>
import jax
import jax.numpy as jnp
from jax import lax
from jax.experimental import pallas as pl
from jax.experimental.pallas import tpu as pltpu


def _conv_bn_relu_kernel(p_ref, w_ref, o_ref):
    # p_ref : (K+1, lanes_blk)  im2col patches + ones row (folded bias)
    # w_ref : (Cout, K+1)       BN/affine/conv-bias-folded weights
    # o_ref : (Cout, lanes_blk) lane-dense output tile
    acc = jnp.dot(w_ref[...], p_ref[...],
                  preferred_element_type=jnp.float32)   # one MXU matmul
    o_ref[...] = jnp.maximum(acc, 0.0).astype(o_ref.dtype)


def _num_tensorcores_hint():
    # v7x has 2 TensorCores per chip -> give each one a lane block.
    try:
        kind = jax.devices()[0].device_kind.lower()
    except Exception:  # pragma: no cover - defensive, detection is best-effort
        return 1
    return 2 if ("v7" in kind or "7x" in kind) else 1


def _choose_num_lane_blocks(total_lanes, bytes_per_lane, min_blocks,
                            vmem_budget_bytes=8 << 20):
    """Pick how many lane blocks to split N*Ho*Wo into.

    Blocks must be a multiple of 128 lanes (or the full axis).  Best-effort
    scale safety: split further until the double-buffered working set fits a
    conservative VMEM budget (well under the scoped default on v5e/v6e/v7x).
    """
    def _ok(nb):
        if nb < 1 or total_lanes % nb:
            return False
        blk = total_lanes // nb
        return blk == total_lanes or blk % 128 == 0

    nb = min_blocks if _ok(min_blocks) else 1
    while (total_lanes // nb) * bytes_per_lane > vmem_budget_bytes and _ok(nb * 2):
        nb *= 2
    return nb


def basic_conv2d_forward(x_nchw, w_oihw, bias, running_mean, running_var,
                         gamma, beta, *, stride=1, padding=1, dilation=1,
                         eps=1e-5, compute_dtype=jnp.bfloat16,
                         out_dtype=jnp.float32, num_lane_blocks=None):
    N, Cin, H, W = x_nchw.shape
    Cout, _, KH, KW = w_oihw.shape
    Ho = (H + 2 * padding - dilation * (KH - 1) - 1) // stride + 1
    Wo = (W + 2 * padding - dilation * (KW - 1) - 1) // stride + 1
    K = Cin * KH * KW
    Kp = K + 1                       # +1 ones row carrying the folded bias
    L = N * Ho * Wo                  # batch collapsed onto the lane axis

    f32 = jnp.float32

    # --- Single fused XLA op: im2col straight into (K, N, Ho, Wo) -----------
    # Output channel axis unrolls as (Cin, KH, KW) -> matches OIHW weights
    # reshaped to (Cout, K).  HIGHEST precision keeps the extraction exact.
    patches = lax.conv_general_dilated_patches(
        x_nchw.astype(f32), (KH, KW), (stride, stride),
        [(padding, padding), (padding, padding)],
        rhs_dilation=(dilation, dilation),
        dimension_numbers=("NCHW", "OIHW", "CNHW"),
        precision=lax.Precision.HIGHEST)                 # (K, N, Ho, Wo)
    patches = patches.reshape(K, L).astype(compute_dtype)
    patches = jnp.concatenate(
        [patches, jnp.ones((1, L), compute_dtype)], axis=0)        # (K+1, L)

    # --- Constant-fold BN(eval) + affine + conv bias into the weights --------
    scale = gamma.astype(f32) * lax.rsqrt(running_var.astype(f32) + eps)  # (Cout,)
    w_mat = w_oihw.reshape(Cout, K).astype(f32) * scale[:, None]          # (Cout, K)
    b_fold = ((bias.astype(f32) - running_mean.astype(f32)) * scale
              + beta.astype(f32))                                         # (Cout,)
    w_ext = jnp.concatenate([w_mat, b_fold[:, None]], axis=1)             # (Cout, K+1)
    w_ext = w_ext.astype(compute_dtype)

    # --- Lane tiling ----------------------------------------------------------
    in_bytes = jnp.dtype(compute_dtype).itemsize
    out_bytes = jnp.dtype(out_dtype).itemsize
    bytes_per_lane = 2 * Kp * in_bytes + 2 * Cout * out_bytes   # double-buffered
    if num_lane_blocks is None:
        num_lane_blocks = _choose_num_lane_blocks(
            L, bytes_per_lane, min_blocks=_num_tensorcores_hint())
    lane_blk = L // num_lane_blocks

    flops = 2 * Cout * Kp * L
    bytes_accessed = (Kp * L * in_bytes + Cout * Kp * in_bytes
                      + Cout * L * out_bytes)

    out = pl.pallas_call(
        _conv_bn_relu_kernel,
        out_shape=jax.ShapeDtypeStruct((Cout, L), out_dtype),
        grid_spec=pltpu.PrefetchScalarGridSpec(
            num_scalar_prefetch=0,
            grid=(num_lane_blocks,),
            in_specs=[
                pl.BlockSpec((Kp, lane_blk), lambda j: (0, j)),
                pl.BlockSpec((Cout, Kp), lambda j: (0, 0)),
            ],
            out_specs=pl.BlockSpec((Cout, lane_blk), lambda j: (0, j)),
        ),
        compiler_params=pltpu.CompilerParams(
            dimension_semantics=("parallel",)),   # lane blocks -> v7x's 2 TCs
        cost_estimate=pl.CostEstimate(flops=int(flops), transcendentals=0,
                                      bytes_accessed=int(bytes_accessed)),
    )(patches, w_ext)

    # (Cout, N*Ho*Wo) -> (N, Cout, Ho, Wo). Tiny (C,N) swap, fuses in XLA.
    return out.reshape(Cout, N, Ho, Wo).transpose(1, 0, 2, 3)


def _reference(x, w, bias, running_mean, running_var, gamma, beta, padding, eps):
    ref = lax.conv_general_dilated(
        x, w, window_strides=(1, 1),
        padding=((padding, padding), (padding, padding)),
        dimension_numbers=("NCHW", "OIHW", "NCHW"),
        precision=lax.Precision.HIGHEST,
    ) + bias[None, :, None, None]
    ref = (ref - running_mean[None, :, None, None]) / jnp.sqrt(
        running_var[None, :, None, None] + eps)
    ref = ref * gamma[None, :, None, None] + beta[None, :, None, None]
    return jnp.maximum(ref, 0.0)


if __name__ == "__main__":
    # Module config: BasicConv2d('single', in_channels=4, out_channels=8,
    #                            kernel_size=3, padding=1), eval mode.
    N, Cin, H, W = 2, 4, 16, 16
    Cout, KH, KW = 8, 3, 3
    padding, eps = 1, 1e-5

    key = jax.random.PRNGKey(0)
    kx, kw, kb, km, kv, kg, kbe = jax.random.split(key, 7)
    x = jax.random.normal(kx, (N, Cin, H, W), jnp.float32)
    w = jax.random.normal(kw, (Cout, Cin, KH, KW), jnp.float32) * 0.1
    bias = jax.random.normal(kb, (Cout,), jnp.float32) * 0.1
    # Non-trivial BN running stats / affine params exercise the folding.
    running_mean = jax.random.normal(km, (Cout,), jnp.float32) * 0.1
    running_var = jax.random.uniform(kv, (Cout,), jnp.float32, 0.5, 1.5)
    gamma = 1.0 + 0.1 * jax.random.normal(kg, (Cout,), jnp.float32)
    beta = 0.1 * jax.random.normal(kbe, (Cout,), jnp.float32)

    ref = _reference(x, w, bias, running_mean, running_var, gamma, beta,
                     padding, eps)

    # f32 MXU-operand path (default lane split for the detected chip).
    out_f32 = basic_conv2d_forward(x, w, bias, running_mean, running_var,
                                   gamma, beta, padding=padding, eps=eps,
                                   compute_dtype=jnp.float32)
    out_f32 = jax.block_until_ready(out_f32)
    assert out_f32.shape == (N, Cout, H, W), out_f32.shape
    assert jnp.allclose(out_f32, ref, atol=5e-4, rtol=5e-4), float(
        jnp.max(jnp.abs(out_f32 - ref)))

    # Fast path: bf16 MXU operands, f32 accumulation.
    out_bf16 = basic_conv2d_forward(x, w, bias, running_mean, running_var,
                                    gamma, beta, padding=padding, eps=eps,
                                    compute_dtype=jnp.bfloat16)
    out_bf16 = jax.block_until_ready(out_bf16)
    assert out_bf16.shape == (N, Cout, H, W), out_bf16.shape
    assert jnp.allclose(out_bf16, ref, atol=3e-2, rtol=3e-2), float(
        jnp.max(jnp.abs(out_bf16 - ref)))

    # Explicit 2-way lane split (the v7x two-TensorCore codepath) — verify it
    # compiles and matches regardless of which chip we are actually on.
    out_split = basic_conv2d_forward(x, w, bias, running_mean, running_var,
                                     gamma, beta, padding=padding, eps=eps,
                                     compute_dtype=jnp.float32,
                                     num_lane_blocks=2)
    out_split = jax.block_until_ready(out_split)
    assert out_split.shape == (N, Cout, H, W), out_split.shape
    assert jnp.allclose(out_split, ref, atol=5e-4, rtol=5e-4), float(
        jnp.max(jnp.abs(out_split - ref)))

    print("KERNEL_OK")
</pallas_src>

<mosaic_0001>
module attributes {stable_mosaic.version = 11 : i64} {
  func.func @_conv_bn_relu_kernel(%arg0: i32, %arg1: memref<37x512xf32, #tpu.memory_space<vmem>>, %arg2: memref<8x37xf32, #tpu.memory_space<vmem>>, %arg3: memref<8x512xf32, #tpu.memory_space<vmem>>) attributes {dimension_semantics = [#tpu.dimension_semantics<parallel>], iteration_bounds = array<i64: 1>, scalar_prefetch = 0 : i64, scratch_operands = 0 : i64, tpu.core_type = #tpu.core_type<tc>, window_params = [{transform_indices = @transform_0, window_bounds = array<i64: 37, 512>}, {pipeline_mode = #tpu.pipeline_mode<synchronous>, transform_indices = @transform_1, window_bounds = array<i64: 8, 37>}, {transform_indices = @transform_2, window_bounds = array<i64: 8, 512>}]} {
    %c0 = arith.constant 0 : index
    %c0_0 = arith.constant 0 : index
    %0 = vector.load %arg2[%c0, %c0_0] : memref<8x37xf32, #tpu.memory_space<vmem>>, vector<8x37xf32>
    %c0_1 = arith.constant 0 : index
    %c0_2 = arith.constant 0 : index
    %1 = vector.load %arg1[%c0_1, %c0_2] : memref<37x512xf32, #tpu.memory_space<vmem>>, vector<37x512xf32>
    %cst = arith.constant dense<0.000000e+00> : vector<8x512xf32>
    %2 = tpu.matmul %0, %1, %cst {dimension_numbers = #tpu.dot_dimension_numbers<[1], [0], [0], [1], [0, 0, 1, 1], [], []>} : vector<8x37xf32>, vector<37x512xf32>, vector<8x512xf32> -> vector<8x512xf32>
    %cst_3 = arith.constant 0.000000e+00 : f32
    %3 = vector.broadcast %cst_3 : f32 to vector<8x512xf32>
    %4 = arith.maximumf %2, %3 : vector<8x512xf32>
    %c0_4 = arith.constant 0 : index
    %c0_5 = arith.constant 0 : index
    %5 = vector.load %arg3[%c0_4, %c0_5] : memref<8x512xf32, #tpu.memory_space<vmem>>, vector<8x512xf32>
    tpu.vector_store %arg3[%c0_4, %c0_5], %4 {strides = array<i32>} : memref<8x512xf32, #tpu.memory_space<vmem>>, vector<8x512xf32>,
    return
  }
  func.func @transform_0(%arg0: i32) -> (i32, i32) {
    %c0_i32 = arith.constant 0 : i32
    %c0_i32_0 = arith.constant 0 : i32
    return %c0_i32, %arg0 : i32, i32
  }
  func.func @transform_1(%arg0: i32) -> (i32, i32) {
    %c0_i32 = arith.constant 0 : i32
    %c0_i32_0 = arith.constant 0 : i32
    %c0_i32_1 = arith.constant 0 : i32
    return %c0_i32, %c0_i32_0 : i32, i32
  }
  func.func @transform_2(%arg0: i32) -> (i32, i32) {
    %c0_i32 = arith.constant 0 : i32
    %c0_i32_0 = arith.constant 0 : i32
    return %c0_i32, %arg0 : i32, i32
  }
}

</mosaic_0001>

<bundles_post_ra>
// kernel: tpu_custom_call.1
= control target key start
LH: loop header
LB: loop body
LE: loop exit
PB: predicated region body
PF: predicated region fallthrough
CT: control target
= control target key end

     0   :  { %7 = vsyncpa [#allocation3], 0  ;;  %s399_s0 = inlined_call_operand.hbm [shape: f32[37,512], index: 0, kind: input, shape index: {}]   ;;  %s400_s1 = inlined_call_operand.hbm [shape: f32[8,37], index: 1, kind: input, shape index: {}]   ;;  %s401_s2 = inlined_call_operand.hbm [shape: f32[8,512], index: 2, kind: output, shape index: {}]  }
   0x1   :  { %8 = vsyncpa [#allocation6], 0 }
   0x2   :  { %9 = vsyncpa [#allocation4], 0  ;;  %s342_s9 = smov [#allocation2]   ;;  %s270_s13 = scalar_lea.hbm %s399_s0, 2560 }
   0x3   :  { %s15_s10 = sshll.u32 %s342_s9, 4  ;;  %p271_p0 = scmp.ne.s32.totalorder %s399_s0, %s270_s13  ;;  %s16_s10 = int_to_ptr.vmem [resolvable:$true] %s15_s10 }
   0x4   :  { %p274_p1 = scmp.lt.u32.totalorder %s270_s13, %s399_s0 }
   0x6   :  { %p276_p2 = pnand %p274_p1, %p271_p0 }
   0x8   :  { %279 = shalt.err (!%p276_p2)
}
   0x9   :  { %s280_s18 = scalar_lea.vmem %s16_s10, 2560  ;;  %p285_p4 = scmp.lt.s32.totalorder %s16_s10, %s16_s10 }
   0xa   :  { %p281_p3 = scmp.ne.s32.totalorder %s16_s10, %s280_s18  ;;  %p286_p5 = scmp.lt.s32.totalorder %s280_s18, %s280_s18 }
   0xc   :  { %p287_p6 = por %p286_p5, %p285_p4 }
   0xe   :  { %p288_p7 = pnand %p287_p6, %p281_p3 }
  0x10   :  { %291 = shalt.err (!%p288_p7)
}
  0x11   :  { %s343_s19 = smov 512   ;;  %s344_s20 = smov 32  }
  0x12   :  { %21 = dma.hbm_to_vmem [thread:$0]  %s399_s0, 2560, %s16_s10, [#allocation3], %s343_s19, %s343_s19, %s344_s20  }
  0x13   :  { %s345_s23 = smov [#allocation5]   ;;  %s292_s27 = scalar_lea.hbm %s400_s1, 128 }
  0x14   :  { %s28_s24 = sshll.u32 %s345_s23, 4  ;;  %p293_p8 = scmp.ne.s32.totalorder %s400_s1, %s292_s27  ;;  %s29_s24 = int_to_ptr.vmem [resolvable:$true] %s28_s24 }
  0x15   :  { %p296_p9 = scmp.lt.u32.totalorder %s292_s27, %s400_s1 }
  0x17   :  { %p298_p10 = pnand %p296_p9, %p293_p8 }
  0x19   :  { %301 = shalt.err (!%p298_p10)
}
  0x1a   :  { %s302_s4 = scalar_lea.vmem %s29_s24, 128  ;;  %p307_p12 = scmp.lt.s32.totalorder %s29_s24, %s29_s24 }
  0x1b   :  { %p303_p11 = scmp.ne.s32.totalorder %s29_s24, %s302_s4  ;;  %p308_p13 = scmp.lt.s32.totalorder %s302_s4, %s302_s4 }
  0x1d   :  { %p309_p0 = por %p308_p13, %p307_p12 }
  0x1f   :  { %p310_p1 = pnand %p309_p0, %p303_p11 }
  0x21   :  { %313 = shalt.err (!%p310_p1)
}
  0x22   :  { %31 = dma.hbm_to_vmem [thread:$0]  %s400_s1, 128, %s29_s24, [#allocation6]  }
  0x23   :  { %336 = dma.done.wait [#allocation3], 2560  }
  0x24   :  { %337 = vsyncadd [#allocation3], 4294964736 }
  0x25   :  { %338 = dma.done.wait [#allocation6], 128  }
  0x26   :  { %339 = vsyncadd [#allocation6], 4294967168  ;;  %v346_v0 = vmov 0.0   ;;  %v40_v1 = vld [vmem:[#allocation2 + $0x8] sm:$0xff]  ;;  %v42_v3 = vld [vmem:[#allocation2 + $0x18] sm:$0xff]  ;;  %vm63_vm0 = vcmask 1044480  }
  0x27   :  { %140 = vmatprep.mubr.f32.mxu0 %v346_v0  ;;  %211 = vmatprep.mubr.f32.mxu1 %v346_v0  ;;  %v44_v2 = vld [vmem:[#allocation2 + $0x28] sm:$0xff]  ;;  %v46_v5 = vld [vmem:[#allocation2 + $0x38] sm:$0xff]  ;;  %v39_v6 = vld [vmem:[#allocation2] sm:$0xff]  ;;  %vm59_vm1 = vcmask 302080   ;;  %s347_s1 = smov [#allocation7]  }
  0x28   :  { %v248_v4 = vpack.c.bf16 %v44_v2, %v40_v1  ;;  %v43_v7 = vld [vmem:[#allocation2 + $0x20] sm:$0xff]  ;;  %v256_v8 = vpack.c.bf16 %v46_v5, %v42_v3  ;;  %v41_v10 = vld [vmem:[#allocation2 + $0x10] sm:$0xff]  ;;  %v48_v12 = vld [vmem:[#allocation2 + $0x48] sm:$0xff]  ;;  %s232_s6 = sshll.u32 %s347_s1, 4  ;;  %s233_s6 = int_to_ptr.vmem [resolvable:$true] %s232_s6 }
  0x29   :  { %v250_v9 = vpack.c.bf16 %v43_v7, %v39_v6  ;;  %v45_v11 = vld [vmem:[#allocation2 + $0x30] sm:$0xff]  ;;  %v52_v14 = vld [vmem:[#allocation2 + $0x68] sm:$0xff]  ;;  %v50_v15 = vld [vmem:[#allocation2 + $0x58] sm:$0xff]  ;;  %s314_s7 = scalar_lea.vmem %s233_s6, 512  ;;  %p319_p3 = scmp.lt.s32.totalorder %s233_s6, %s233_s6 }
  0x2a   :  { %249 = vmatprep.subr.bf16.mxu0 %v248_v4  ;;  %v258_v13 = vpack.c.bf16 %v45_v11, %v41_v10  ;;  %v54_v16 = vld [vmem:[#allocation2 + $0x78] sm:$0xff]  ;;  %257 = vmatprep.subr.bf16.mxu1 %v256_v8  ;;  %v252_v17 = vpack.c.bf16 %v52_v14, %v48_v12  ;;  %v47_v19 = vld [vmem:[#allocation2 + $0x40] sm:$0xff]  ;;  %v49_v21 = vld [vmem:[#allocation2 + $0x50] sm:$0xff]  ;;  %p315_p2 = scmp.ne.s32.totalorder %s233_s6, %s314_s7  ;;  %p320_p4 = scmp.lt.s32.totalorder %s314_s7, %s314_s7 }
  0x2b   :  { %251 = vmatpush1.bf16.msra.mxu0 %v250_v9  ;;  %v260_v18 = vpack.c.bf16 %v54_v16, %v50_v15  ;;  %v51_v20 = vld [vmem:[#allocation2 + $0x60] sm:$0xff]  ;;  %v53_v23 = vld [vmem:[#allocation2 + $0x70] sm:$0xff]  ;;  %v56_v25 = vld [vmem:[#allocation2 + $0x88] sm:$0x1f] }
  0x2c   :  { %259 = vmatpush1.bf16.msra.mxu1 %v258_v13  ;;  %v254_v22 = vpack.c.bf16 %v51_v20, %v47_v19  ;;  %253 = vmatprep.subr.bf16.mxu0 %v252_v17  ;;  %v262_v24 = vpack.c.bf16 %v53_v23, %v49_v21  ;;  %v58_v26 = vld [vmem:[#allocation2 + $0x98] sm:$0x1f]  ;;  %v55_v27 = vld [vmem:[#allocation2 + $0x80] sm:$0x1f]  ;;  %v57_v28 = vld [vmem:[#allocation2 + $0x90] sm:$0x1f]  ;;  %p321_p5 = por %p320_p4, %p319_p3 }
  0x2d   :  { %261 = vmatprep.subr.bf16.mxu1 %v260_v18  ;;  %v38_v29 = vld [vmem:[#allocation5] sm:$0xff] }
  0x2e   :  { %p322_p6 = pnand %p321_p5, %p315_p2 }
  0x2f   :  { %255 = vmatpush1.bf16.msra.mxu0 %v254_v22 }
  0x30   :  { %263 = vmatpush1.bf16.msra.mxu1 %v262_v24  ;;  %242 = vmatprep.subr.msk.mxu0 %vm63_vm0, %v56_v25 }
  0x31   :  { %245 = vmatprep.subr.msk.mxu1 %vm63_vm0, %v58_v26 }
  0x33   :  { %243 = vmatpush1.msk.msra.mxu0 %vm63_vm0, %v55_v27 }
  0x34   :  { %246 = vmatpush1.msk.msra.mxu1 %vm63_vm0, %v57_v28  ;;  %244 = vmatmul.mubr.msk.f32.vlgmr.msra.gmra.mrb[0].mxu0 %vm59_vm1, %v38_v29 }
  0x35   :  { %247 = vmatmul.mubr.msk.f32.vlgmr.msra.gmra.mrb[0].mxu1 %vm59_vm1, %v38_v29 }
 0x107   :  { %v142_v30 = vpop.f32.mrb[0].mxu0 }
 0x108   :  { %v218_v31 = vmax.f32 %v142_v30, 0.0  ;;  %v213_v32 = vpop.f32.mrb[0].mxu1  ;;  %v144_v33 = vpop.f32.mrb[1].mxu0 }
 0x109   :  { %v220_v34 = vmax.f32 %v213_v32, 0.0  ;;  %v219_v35 = vmax.f32 %v144_v33, 0.0  ;;  %v215_v36 = vpop.f32.mrb[1].mxu1 }
 0x10a   :  { %222 = vst [vmem:[#allocation7] sm:$0xff] %v218_v31  ;;  %v221_v37 = vmax.f32 %v215_v36, 0.0 }
 0x10b   :  { %224 = vst [vmem:[#allocation7 + $0x10] sm:$0xff] %v220_v34  ;;  %223 = vst [vmem:[#allocation7 + $0x8] sm:$0xff] %v219_v35 }
 0x10c   :  { %225 = vst [vmem:[#allocation7 + $0x18] sm:$0xff] %v221_v37 }
 0x10d   :  { %325 = shalt.err (!%p322_p6)
}
 0x10e   :  { %s326_s10 = scalar_lea.hbm %s401_s2, 512 }
 0x10f   :  { %p327_p7 = scmp.ne.s32.totalorder %s401_s2, %s326_s10  ;;  %p330_p8 = scmp.lt.u32.totalorder %s326_s10, %s401_s2 }
 0x111   :  { %p332_p9 = pnand %p330_p8, %p327_p7 }
 0x113   :  { %335 = shalt.err (!%p332_p9)
}
 0x114   :  { %235 = dma.vmem_to_hbm [thread:$0]  %s233_s6, 512, %s401_s2, [#allocation4]  }
 0x115   :  { %340 = dma.done.wait [#allocation4], 512  }
 0x116   :  { %341 = vsyncadd [#allocation4], 4294966784 }
 0x117   :  { %239 = vsyncpa [#allocation3], 1 }
 0x118   :  { %240 = vsyncpa [#allocation6], 1 }
 0x119   :  { %241 = vsyncpa [#allocation4], 1 }

</bundles_post_ra>
